<compile_context>
chip_gen: v5e
topology: v5e:2x2
jax: 0.10.0
libtpu: 0.0.40
codegen_flags: <defaults>
</compile_context>

<pallas_src>
import math
import functools

import jax
import jax.numpy as jnp
from jax.experimental import pallas as pl
from jax.experimental.pallas import tpu as pltpu


# ----------------------------------------------------------------------------
# Generic linear: y = x @ W^T + b   (PyTorch nn.Linear semantics)
# ----------------------------------------------------------------------------
def _linear_kernel(x_ref, wt_ref, b_ref, o_ref):
    # x_ref: (tm, d_in), wt_ref: (d_in, d_out), b_ref: (1, d_out)
    acc = jnp.dot(x_ref[...], wt_ref[...], preferred_element_type=jnp.float32)
    o_ref[...] = (acc + b_ref[...].astype(jnp.float32)).astype(o_ref.dtype)


def linear(x, w, b, *, tile_m=512):
    """x: (M, d_in), w: (d_out, d_in), b: (d_out,) -> (M, d_out)."""
    M, d_in = x.shape
    d_out = w.shape[0]
    wt = w.T                           # (d_in, d_out)
    b2 = b.reshape(1, d_out)
    tm = min(tile_m, M)                # 512 is a multiple of 8; tm==M otherwise
    grid = (pl.cdiv(M, tm),)
    return pl.pallas_call(
        _linear_kernel,
        out_shape=jax.ShapeDtypeStruct((M, d_out), x.dtype),
        grid_spec=pltpu.PrefetchScalarGridSpec(
            num_scalar_prefetch=0,
            grid=grid,
            in_specs=[
                pl.BlockSpec((tm, d_in), lambda i: (i, 0)),
                pl.BlockSpec((d_in, d_out), lambda i: (0, 0)),   # resident
                pl.BlockSpec((1, d_out), lambda i: (0, 0)),      # resident
            ],
            out_specs=pl.BlockSpec((tm, d_out), lambda i: (i, 0)),
        ),
        compiler_params=pltpu.CompilerParams(
            dimension_semantics=("parallel",)),
    )(x, wt, b2)


# ----------------------------------------------------------------------------
# Fused QKV projection (self-attention path): one matmul, three outputs.
# ----------------------------------------------------------------------------
def _qkv_linear_kernel(x_ref, wt_ref, b_ref, q_ref, k_ref, v_ref):
    # x_ref: (tm, d_in), wt_ref: (d_in, 3*d_out), b_ref: (1, 3*d_out)
    acc = jnp.dot(x_ref[...], wt_ref[...], preferred_element_type=jnp.float32)
    acc = acc + b_ref[...].astype(jnp.float32)
    d = q_ref.shape[-1]
    q_ref[...] = acc[:, 0 * d:1 * d].astype(q_ref.dtype)
    k_ref[...] = acc[:, 1 * d:2 * d].astype(k_ref.dtype)
    v_ref[...] = acc[:, 2 * d:3 * d].astype(v_ref.dtype)


def qkv_linear(x, wq, bq, wk, bk, wv, bv, *, tile_m=512):
    """x: (M, d_in) -> (q, k, v), each (M, d_out); single activation read."""
    M, d_in = x.shape
    d_out = wq.shape[0]
    wt = jnp.concatenate([wq, wk, wv], axis=0).T        # (d_in, 3*d_out)
    b2 = jnp.concatenate([bq, bk, bv]).reshape(1, 3 * d_out)
    tm = min(tile_m, M)
    grid = (pl.cdiv(M, tm),)
    shp = jax.ShapeDtypeStruct((M, d_out), x.dtype)
    out_spec = pl.BlockSpec((tm, d_out), lambda i: (i, 0))
    return pl.pallas_call(
        _qkv_linear_kernel,
        out_shape=(shp, shp, shp),
        grid_spec=pltpu.PrefetchScalarGridSpec(
            num_scalar_prefetch=0,
            grid=grid,
            in_specs=[
                pl.BlockSpec((tm, d_in), lambda i: (i, 0)),
                pl.BlockSpec((d_in, 3 * d_out), lambda i: (0, 0)),  # resident
                pl.BlockSpec((1, 3 * d_out), lambda i: (0, 0)),     # resident
            ],
            out_specs=(out_spec, out_spec, out_spec),
        ),
        compiler_params=pltpu.CompilerParams(
            dimension_semantics=("parallel",)),
    )(x, wt, b2)


# ----------------------------------------------------------------------------
# Scaled dot-product attention: one grid step per batch, all heads batched.
# ----------------------------------------------------------------------------
def _attention_kernel(q_ref, k_ref, v_ref, ctx_ref, p_ref, *, h, scale):
    # q_ref: (Sq, d_model), k_ref/v_ref: (Sk, d_model)  (batch dim squeezed)
    # ctx_ref: (Sq, d_model), p_ref: (h, Sq, Sk)
    d_model = q_ref.shape[-1]
    d_k = d_model // h

    q = q_ref[...] * scale          # fold 1/sqrt(d_k) into Q (native dtype)
    k = k_ref[...]
    v = v_ref[...]

    for head in range(h):           # unrolled; heads share this grid step
        lo = head * d_k
        qh = q[:, lo:lo + d_k]
        kh = k[:, lo:lo + d_k]
        vh = v[:, lo:lo + d_k]

        # scores = (Q/sqrt(d_k)) K^T   (MXU, f32 accumulation)
        s = jnp.einsum("qd,kd->qk", qh, kh,
                       preferred_element_type=jnp.float32)

        # numerically-stable softmax; reciprocal goes to the EUP slot
        m = jnp.max(s, axis=-1, keepdims=True)
        e = jnp.exp(s - m)
        denom = jnp.sum(e, axis=-1, keepdims=True)
        p = e * pl.reciprocal(denom, approx=True)

        p_ref[head, :, :] = p.astype(p_ref.dtype)            # attention map
        ctx = jnp.dot(p.astype(vh.dtype), vh,
                      preferred_element_type=jnp.float32)    # P @ V (MXU)
        ctx_ref[:, lo:lo + d_k] = ctx.astype(ctx_ref.dtype)  # lane-dense block


def scaled_dot_product_attention(q, k, v, *, h):
    """q: (B, Sq, d_model), k/v: (B, Sk, d_model) ->
       ctx (B, Sq, d_model)  [already in output-projection layout],
       p   (B, h, Sq, Sk)."""
    B, Sq, d_model = q.shape
    Sk = k.shape[1]
    d_k = d_model // h
    scale = 1.0 / math.sqrt(d_k)
    kernel = functools.partial(_attention_kernel, h=h, scale=scale)

    ctx, p_attn = pl.pallas_call(
        kernel,
        out_shape=(
            jax.ShapeDtypeStruct((B, Sq, d_model), q.dtype),
            jax.ShapeDtypeStruct((B, h, Sq, Sk), q.dtype),
        ),
        grid_spec=pltpu.PrefetchScalarGridSpec(
            num_scalar_prefetch=0,
            grid=(B,),
            in_specs=[
                pl.BlockSpec((None, Sq, d_model), lambda b: (b, 0, 0)),
                pl.BlockSpec((None, Sk, d_model), lambda b: (b, 0, 0)),
                pl.BlockSpec((None, Sk, d_model), lambda b: (b, 0, 0)),
            ],
            out_specs=(
                pl.BlockSpec((None, Sq, d_model), lambda b: (b, 0, 0)),
                pl.BlockSpec((None, h, Sq, Sk), lambda b: (b, 0, 0, 0)),
            ),
        ),
        compiler_params=pltpu.CompilerParams(
            dimension_semantics=("parallel",)),
    )(q, k, v)
    return ctx, p_attn


# ----------------------------------------------------------------------------
# Full MultiHeadedAttention forward.
# ----------------------------------------------------------------------------
def multi_head_attention(query, key, value, params, *, h):
    B, Sq, d_model = query.shape
    Sk = key.shape[1]

    if (key is query) and (value is query):
        # Self-attention (the tbsrn usage): fused QKV projection.
        q_p, k_p, v_p = qkv_linear(
            query.reshape(B * Sq, d_model),
            params["wq"], params["bq"],
            params["wk"], params["bk"],
            params["wv"], params["bv"])
    else:
        q_p = linear(query.reshape(B * Sq, d_model), params["wq"], params["bq"])
        k_p = linear(key.reshape(B * Sk, d_model), params["wk"], params["bk"])
        v_p = linear(value.reshape(B * Sk, d_model), params["wv"], params["bv"])

    q_p = q_p.reshape(B, Sq, d_model)       # contiguous reshapes only
    k_p = k_p.reshape(B, Sk, d_model)
    v_p = v_p.reshape(B, Sk, d_model)

    ctx, p_attn = scaled_dot_product_attention(q_p, k_p, v_p, h=h)

    out = linear(ctx.reshape(B * Sq, d_model), params["wo"], params["bo"])
    return out.reshape(B, Sq, d_model), p_attn


# ----------------------------------------------------------------------------
# Pure-JAX reference (mirrors the PyTorch module, eval mode, mask=None).
# ----------------------------------------------------------------------------
def mha_ref(query, key, value, params, *, h):
    B, Sq, d_model = query.shape
    d_k = d_model // h
    hi = jax.lax.Precision.HIGHEST

    def lin(x, w, b):
        return jnp.einsum("bsd,od->bso", x, w, precision=hi) + b

    def split(x):
        return x.reshape(B, -1, h, d_k).transpose(0, 2, 1, 3)

    q = split(lin(query, params["wq"], params["bq"]))
    k = split(lin(key, params["wk"], params["bk"]))
    v = split(lin(value, params["wv"], params["bv"]))

    scores = jnp.einsum("bhqd,bhkd->bhqk", q, k, precision=hi) / math.sqrt(d_k)
    p = jax.nn.softmax(scores, axis=-1)
    ctx = jnp.einsum("bhqk,bhkd->bhqd", p, v, precision=hi)
    ctx = ctx.transpose(0, 2, 1, 3).reshape(B, Sq, d_model)
    out = jnp.einsum("bsd,od->bso", ctx, params["wo"], precision=hi) + params["bo"]
    return out, p


if __name__ == "__main__":
    root = jax.random.PRNGKey(0)
    B, S, h, d_model = 2, 8, 4, 32
    keys = jax.random.split(root, 12)
    ws = 1.0 / math.sqrt(d_model)

    params = {
        "wq": jax.random.normal(keys[0], (d_model, d_model), jnp.float32) * ws,
        "bq": jax.random.normal(keys[1], (d_model,), jnp.float32) * 0.1,
        "wk": jax.random.normal(keys[2], (d_model, d_model), jnp.float32) * ws,
        "bk": jax.random.normal(keys[3], (d_model,), jnp.float32) * 0.1,
        "wv": jax.random.normal(keys[4], (d_model, d_model), jnp.float32) * ws,
        "bv": jax.random.normal(keys[5], (d_model,), jnp.float32) * 0.1,
        "wo": jax.random.normal(keys[6], (d_model, d_model), jnp.float32) * ws,
        "bo": jax.random.normal(keys[7], (d_model,), jnp.float32) * 0.1,
    }

    # --- case 1: self-attention (fused QKV path; this is how tbsrn uses it) ---
    x = jax.random.normal(keys[8], (B, S, d_model), jnp.float32)
    out1, attn1 = multi_head_attention(x, x, x, params, h=h)
    out1 = jax.block_until_ready(out1)
    attn1 = jax.block_until_ready(attn1)
    ref_out1, ref_attn1 = mha_ref(x, x, x, params, h=h)

    assert out1.shape == (B, S, d_model), out1.shape
    assert attn1.shape == (B, h, S, S), attn1.shape
    assert jnp.allclose(attn1, ref_attn1, atol=2e-3, rtol=2e-3), (
        "self-attn map mismatch, max err "
        f"{float(jnp.max(jnp.abs(attn1 - ref_attn1)))}")
    assert jnp.allclose(out1, ref_out1, atol=5e-3, rtol=5e-3), (
        "self-attn output mismatch, max err "
        f"{float(jnp.max(jnp.abs(out1 - ref_out1)))}")

    # --- case 2: distinct query/key/value (separate-projection fallback) ---
    query = jax.random.normal(keys[9], (B, S, d_model), jnp.float32)
    key_in = jax.random.normal(keys[10], (B, S, d_model), jnp.float32)
    value = jax.random.normal(keys[11], (B, S, d_model), jnp.float32)
    out2, attn2 = multi_head_attention(query, key_in, value, params, h=h)
    out2 = jax.block_until_ready(out2)
    attn2 = jax.block_until_ready(attn2)
    ref_out2, ref_attn2 = mha_ref(query, key_in, value, params, h=h)

    assert jnp.allclose(attn2, ref_attn2, atol=2e-3, rtol=2e-3), (
        "cross-attn map mismatch, max err "
        f"{float(jnp.max(jnp.abs(attn2 - ref_attn2)))}")
    assert jnp.allclose(out2, ref_out2, atol=5e-3, rtol=5e-3), (
        "cross-attn output mismatch, max err "
        f"{float(jnp.max(jnp.abs(out2 - ref_out2)))}")

    print("KERNEL_OK")
</pallas_src>

<mosaic_0001>
module attributes {stable_mosaic.version = 11 : i64} {
  func.func @_qkv_linear_kernel(%arg0: i32, %arg1: memref<16x32xf32, #tpu.memory_space<vmem>>, %arg2: memref<32x96xf32, #tpu.memory_space<vmem>>, %arg3: memref<1x96xf32, #tpu.memory_space<vmem>>, %arg4: memref<16x32xf32, #tpu.memory_space<vmem>>, %arg5: memref<16x32xf32, #tpu.memory_space<vmem>>, %arg6: memref<16x32xf32, #tpu.memory_space<vmem>>) attributes {dimension_semantics = [#tpu.dimension_semantics<parallel>], iteration_bounds = array<i64: 1>, scalar_prefetch = 0 : i64, scratch_operands = 0 : i64, tpu.core_type = #tpu.core_type<tc>, window_params = [{transform_indices = @transform_0, window_bounds = array<i64: 16, 32>}, {pipeline_mode = #tpu.pipeline_mode<synchronous>, transform_indices = @transform_1, window_bounds = array<i64: 32, 96>}, {pipeline_mode = #tpu.pipeline_mode<synchronous>, transform_indices = @transform_2, window_bounds = array<i64: 1, 96>}, {transform_indices = @transform_3, window_bounds = array<i64: 16, 32>}, {transform_indices = @transform_4, window_bounds = array<i64: 16, 32>}, {transform_indices = @transform_5, window_bounds = array<i64: 16, 32>}]} {
    %c0 = arith.constant 0 : index
    %c0_0 = arith.constant 0 : index
    %0 = vector.load %arg1[%c0, %c0_0] : memref<16x32xf32, #tpu.memory_space<vmem>>, vector<16x32xf32>
    %c0_1 = arith.constant 0 : index
    %c0_2 = arith.constant 0 : index
    %1 = vector.load %arg2[%c0_1, %c0_2] : memref<32x96xf32, #tpu.memory_space<vmem>>, vector<32x96xf32>
    %cst = arith.constant dense<0.000000e+00> : vector<16x96xf32>
    %2 = tpu.matmul %0, %1, %cst {dimension_numbers = #tpu.dot_dimension_numbers<[1], [0], [0], [1], [0, 0, 1, 1], [], []>} : vector<16x32xf32>, vector<32x96xf32>, vector<16x96xf32> -> vector<16x96xf32>
    %c0_3 = arith.constant 0 : index
    %c0_4 = arith.constant 0 : index
    %3 = vector.load %arg3[%c0_3, %c0_4] : memref<1x96xf32, #tpu.memory_space<vmem>>, vector<1x96xf32>
    %4 = vector.broadcast %3 : vector<1x96xf32> to vector<16x96xf32>
    %5 = arith.addf %2, %4 : vector<16x96xf32>
    %6 = vector.extract_strided_slice %5 {offsets = [0, 0], sizes = [16, 32], strides = [1, 1]} : vector<16x96xf32> to vector<16x32xf32>
    %c0_5 = arith.constant 0 : index
    %c0_6 = arith.constant 0 : index
    %7 = vector.load %arg4[%c0_5, %c0_6] : memref<16x32xf32, #tpu.memory_space<vmem>>, vector<16x32xf32>
    tpu.vector_store %arg4[%c0_5, %c0_6], %6 {strides = array<i32>} : memref<16x32xf32, #tpu.memory_space<vmem>>, vector<16x32xf32>,
    %8 = vector.extract_strided_slice %5 {offsets = [0, 32], sizes = [16, 32], strides = [1, 1]} : vector<16x96xf32> to vector<16x32xf32>
    %c0_7 = arith.constant 0 : index
    %c0_8 = arith.constant 0 : index
    %9 = vector.load %arg5[%c0_7, %c0_8] : memref<16x32xf32, #tpu.memory_space<vmem>>, vector<16x32xf32>
    tpu.vector_store %arg5[%c0_7, %c0_8], %8 {strides = array<i32>} : memref<16x32xf32, #tpu.memory_space<vmem>>, vector<16x32xf32>,
    %10 = vector.extract_strided_slice %5 {offsets = [0, 64], sizes = [16, 32], strides = [1, 1]} : vector<16x96xf32> to vector<16x32xf32>
    %c0_9 = arith.constant 0 : index
    %c0_10 = arith.constant 0 : index
    %11 = vector.load %arg6[%c0_9, %c0_10] : memref<16x32xf32, #tpu.memory_space<vmem>>, vector<16x32xf32>
    tpu.vector_store %arg6[%c0_9, %c0_10], %10 {strides = array<i32>} : memref<16x32xf32, #tpu.memory_space<vmem>>, vector<16x32xf32>,
    return
  }
  func.func @transform_0(%arg0: i32) -> (i32, i32) {
    %c0_i32 = arith.constant 0 : i32
    %c0_i32_0 = arith.constant 0 : i32
    return %arg0, %c0_i32 : i32, i32
  }
  func.func @transform_1(%arg0: i32) -> (i32, i32) {
    %c0_i32 = arith.constant 0 : i32
    %c0_i32_0 = arith.constant 0 : i32
    %c0_i32_1 = arith.constant 0 : i32
    return %c0_i32, %c0_i32_0 : i32, i32
  }
  func.func @transform_2(%arg0: i32) -> (i32, i32) {
    %c0_i32 = arith.constant 0 : i32
    %c0_i32_0 = arith.constant 0 : i32
    %c0_i32_1 = arith.constant 0 : i32
    return %c0_i32, %c0_i32_0 : i32, i32
  }
  func.func @transform_3(%arg0: i32) -> (i32, i32) {
    %c0_i32 = arith.constant 0 : i32
    %c0_i32_0 = arith.constant 0 : i32
    return %arg0, %c0_i32 : i32, i32
  }
  func.func @transform_4(%arg0: i32) -> (i32, i32) {
    %c0_i32 = arith.constant 0 : i32
    %c0_i32_0 = arith.constant 0 : i32
    return %arg0, %c0_i32 : i32, i32
  }
  func.func @transform_5(%arg0: i32) -> (i32, i32) {
    %c0_i32 = arith.constant 0 : i32
    %c0_i32_0 = arith.constant 0 : i32
    return %arg0, %c0_i32 : i32, i32
  }
}

</mosaic_0001>

<bundles_post_ra>
// kernel: tpu_custom_call.1
= control target key start
LH: loop header
LB: loop body
LE: loop exit
PB: predicated region body
PF: predicated region fallthrough
CT: control target
= control target key end

     0   :  { %11 = vsyncpa [#allocation3], 0  ;;  %s390_s0 = inlined_call_operand.hbm [shape: f32[16,32], index: 0, kind: input, shape index: {}]   ;;  %s391_s1 = inlined_call_operand.hbm [shape: f32[32,96], index: 1, kind: input, shape index: {}]   ;;  %s392_s2 = inlined_call_operand.vmem [shape: f32[1,96], index: 2, kind: input, shape index: {}]   ;;  %s393_s3 = inlined_call_operand.hbm [shape: f32[16,32], index: 3, kind: output, shape index: {0}]   ;;  %s394_s4 = inlined_call_operand.hbm [shape: f32[16,32], index: 4, kind: output, shape index: {1}]   ;;  %s395_s5 = inlined_call_operand.hbm [shape: f32[16,32], index: 5, kind: output, shape index: {2}]  }
   0x1   :  { %12 = vsyncpa [#allocation6], 0 }
   0x2   :  { %13 = vsyncpa [#allocation4], 0 }
   0x3   :  { %14 = vsyncpa [#allocation9], 0  ;;  %s19_s20 = sshll.u32 %s390_s0, 4  ;;  %s310_s21 = smov [#allocation2]   ;;  %s20_s20 = int_to_ptr.hbm [resolvable:$true] %s19_s20 }
   0x4   :  { %s21_s22 = sshll.u32 %s310_s21, 4  ;;  %s32_s25 = sshll.u32 %s391_s1, 4  ;;  %s22_s22 = int_to_ptr.vmem [resolvable:$true] %s21_s22  ;;  %s33_s25 = int_to_ptr.hbm [resolvable:$true] %s32_s25 }
   0x5   :  { %s311_s26 = smov 128   ;;  %s312_s27 = smov 8  }
   0x6   :  { %27 = dma.hbm_to_vmem [thread:$0]  %s20_s20, 256, %s22_s22, [#allocation3], %s311_s26, %s311_s26, %s312_s27  }
   0x7   :  { %s313_s28 = smov [#allocation5]  }
   0x8   :  { %s34_s29 = sshll.u32 %s313_s28, 4  ;;  %s35_s29 = int_to_ptr.vmem [resolvable:$true] %s34_s29 }
   0x9   :  { %40 = dma.hbm_to_vmem [thread:$0]  %s33_s25, 512, %s35_s29, [#allocation6], %s311_s26, %s311_s26, %s312_s27  }
   0xa   :  { %302 = dma.done.wait [#allocation3], 256  }
   0xb   :  { %303 = vsyncadd [#allocation3], 4294967040 }
   0xc   :  { %304 = dma.done.wait [#allocation6], 512  }
   0xd   :  { %305 = vsyncadd [#allocation6], 4294966784  ;;  %v56_v0 = vld [vmem:[#allocation5 + $0x18] sm:$0xff]  ;;  %v55_v1 = vld [vmem:[#allocation5 + $0x10] sm:$0xff]  ;;  %vm61_vm0 = vcmask 261120   ;;  %s117_s7 = sshll.u32 %s393_s3, 4  ;;  %s118_s7 = int_to_ptr.hbm [resolvable:$true] %s117_s7 }
   0xe   :  { %80 = vmatpush.msra.mxu0 %v56_v0  ;;  %168 = vmatpush.msra.mxu1 %v56_v0  ;;  %v54_v2 = vld [vmem:[#allocation5 + $0x8] sm:$0xff]  ;;  %v53_v3 = vld [vmem:[#allocation5] sm:$0xff]  ;;  %v51_v4 = vld [vmem:[#allocation2] sm:$0xff]  ;;  %s314_s8 = smov [#allocation7]   ;;  %s315_s10 = smov 64  }
   0xf   :  { %v52_v5 = vld [vmem:[#allocation2 + $0x8] sm:$0xff]  ;;  %v181_v6 = vld [vmem:[%s392_s2] ss:$0 sm:$0xff]  ;;  %s115_s9 = sshll.u32 %s314_s8, 4  ;;  %s316_s11 = smov 96   ;;  %s116_s9 = int_to_ptr.vmem [resolvable:$true] %s115_s9 }
  0x10   :  { %81 = vmatpush.msra.mxu0 %v55_v1  ;;  %169 = vmatpush.msra.mxu1 %v55_v1  ;;  %s317_s2 = smov [#allocation8]   ;;  %s130_s14 = sshll.u32 %s394_s4, 4  ;;  %s131_s14 = int_to_ptr.hbm [resolvable:$true] %s130_s14 }
  0x11   :  { %s128_s3 = sshll.u32 %s317_s2, 4  ;;  %s318_s15 = smov [#allocation10]   ;;  %s129_s3 = int_to_ptr.vmem [resolvable:$true] %s128_s3 }
  0x12   :  { %82 = vmatpush.msra.mxu0 %v54_v2  ;;  %170 = vmatpush.msra.mxu1 %v54_v2  ;;  %s141_s16 = sshll.u32 %s318_s15, 4  ;;  %s143_s19 = sshll.u32 %s395_s5, 4  ;;  %s142_s16 = int_to_ptr.vmem [resolvable:$true] %s141_s16  ;;  %s144_s19 = int_to_ptr.hbm [resolvable:$true] %s143_s19 }
  0x14   :  { %83 = vmatpush.msra.mxu0 %v53_v3  ;;  %171 = vmatpush.msra.mxu1 %v53_v3 }
  0x15   :  { %166 = vmatmul.msk.f32.vlgmr.msra.gmra.mxu0 %vm61_vm0, %v51_v4  ;;  %167 = vmatmul.msk.f32.vlgmr.msra.gmra.mxu1 %vm61_vm0, %v52_v5 }
  0x92   :  { %v85_v7 = vpop.f32.mrf.mxu0  ;;  %v88_v8 = vpop.f32.mrf.mxu1 }
  0x93   :  { %v86_v9 = vadd.f32 %v181_v6, %v85_v7  ;;  %v89_v10 = vadd.f32 %v181_v6, %v88_v8 }
  0x95   :  { %91 = vst.msk [vmem:[#allocation7] sm:$0xff] %vm61_vm0, %v86_v9  ;;  %103 = vrot.lane.b32.xlu1 %v86_v9, %s315_s10  ;;  %95 = vrot.lane.b32.xlu0 %v86_v9, %s316_s11 }
  0x96   :  { %92 = vst.msk [vmem:[#allocation7 + $0x8] sm:$0xff] %vm61_vm0, %v89_v10 }
  0x97   :  { %123 = dma.vmem_to_hbm [thread:$0]  %s116_s9, 256, %s118_s7, [#allocation4], %s311_s26, %s311_s26, %s312_s27  }
  0x9d   :  { %105 = vrot.lane.b32.xlu1 %v89_v10, %s315_s10  ;;  %97 = vrot.lane.b32.xlu0 %v89_v10, %s316_s11 }
 0x107   :  { %v104_v11 = vpop.permute.xlu1 %103  ;;  %v96_v12 = vpop.permute.xlu0 %95 }
 0x108   :  { %109 = vst.msk [vmem:[#allocation10] sm:$0xff] %vm61_vm0, %v104_v11 }
 0x109   :  { %101 = vst.msk [vmem:[#allocation8] sm:$0xff] %vm61_vm0, %v96_v12 }
 0x10f   :  { %v106_v13 = vpop.permute.xlu1 %105  ;;  %v98_v14 = vpop.permute.xlu0 %97 }
 0x110   :  { %110 = vst.msk [vmem:[#allocation10 + $0x8] sm:$0xff] %vm61_vm0, %v106_v13 }
 0x111   :  { %102 = vst.msk [vmem:[#allocation8 + $0x8] sm:$0xff] %vm61_vm0, %v98_v14 }
 0x112   :  { %136 = dma.vmem_to_hbm [thread:$0]  %s129_s3, 256, %s131_s14, [#allocation9], %s311_s26, %s311_s26, %s312_s27  }
 0x113   :  { %149 = dma.vmem_to_hbm [thread:$0]  %s142_s16, 256, %s144_s19, [#allocation9], %s311_s26, %s311_s26, %s312_s27  }
 0x114   :  { %306 = dma.done.wait [#allocation4], 256  }
 0x115   :  { %307 = vsyncadd [#allocation4], 4294967040 }
 0x116   :  { %308 = dma.done.wait [#allocation9], 512  }
 0x117   :  { %309 = vsyncadd [#allocation9], 4294966784 }
 0x118   :  { %162 = vsyncpa [#allocation3], 1 }
 0x119   :  { %163 = vsyncpa [#allocation6], 1 }
 0x11a   :  { %164 = vsyncpa [#allocation4], 1 }
 0x11b   :  { %165 = vsyncpa [#allocation9], 1 }

</bundles_post_ra>
